<compile_context>
chip_gen: v7x
topology: tpu7x:2x2x1
jax: 0.10.0
libtpu: 0.0.40
codegen_flags: <defaults>
</compile_context>

<pallas_src>
import functools

import jax
import jax.numpy as jnp
import numpy as np
from jax.experimental import pallas as pl
from jax.experimental.pallas import tpu as pltpu

BN_EPS = 1e-5


# --------------------------------- kernel ------------------------------------
def _basic_block_enc_kernel(x_ref, b1_ref, g1_ref, be1_ref,
                            b2_ref, g2_ref, be2_ref,
                            o_ref, cat_ref, *, channels, inv_count):
    """Fused conv3x3-bn-relu-conv3x3-bn-add-relu on a lane-dense (H, N*W*C) layout.

    x_ref   : (H, L)     f32   L = N*W*C, lane index = n*(W*C) + w*C + c
    b*_ref  : (3*L, L)   bf16  stacked banded conv weights (kh = -1, 0, +1 blocks)
    g*/be*  : (1, L)     f32   BN gamma / beta tiled over the (n, w) lane groups
    o_ref   : (H, L)     f32
    cat_ref : (H, 3*L)   bf16  VMEM scratch: [a_up | a | a_dn] lane-concatenated
    """
    x = x_ref[...]
    h_rows, lanes = x.shape

    # Boundary masks for the vertical halo (zero padding), built from an iota (VPU).
    row = jax.lax.broadcasted_iota(jnp.int32, (h_rows, lanes), 0)
    top = row == 0
    bot = row == h_rows - 1

    def conv3x3(a, b_ref):
        # Vertical halo via XLU sublane rotations + boundary masks, then ONE merged
        # K = 3*L MXU contraction folding the horizontal taps + channel mixing.
        a_up = jnp.where(top, 0.0, pltpu.roll(a, shift=1, axis=0))           # a[h-1]
        a_dn = jnp.where(bot, 0.0, pltpu.roll(a, shift=h_rows - 1, axis=0))  # a[h+1]
        cat_ref[:, 0:lanes] = a_up.astype(cat_ref.dtype)
        cat_ref[:, lanes:2 * lanes] = a.astype(cat_ref.dtype)
        cat_ref[:, 2 * lanes:3 * lanes] = a_dn.astype(cat_ref.dtype)
        return jnp.dot(cat_ref[...], b_ref[...],
                       preferred_element_type=jnp.float32)

    def channel_allsum(v):
        # Sum lanes sharing the same channel id (lane % channels) with a log-depth
        # roll-and-add tree (XLU + VPU, full f32).  Requires L / channels = N*W to be
        # a power of two (asserted in the wrapper).  Result is replicated per lane.
        s = v
        step = channels
        while step < lanes:
            s = s + pltpu.roll(s, shift=step, axis=1)
            step *= 2
        return s

    def batchnorm(y, gamma_l, beta_l):
        # Training-mode BN (biased batch variance); statistics computed fully in f32,
        # affine folded into a single per-lane scale/shift FMA.
        s1 = channel_allsum(jnp.sum(y, axis=0, keepdims=True))       # (1, L)
        s2 = channel_allsum(jnp.sum(y * y, axis=0, keepdims=True))   # (1, L)
        mean = s1 * inv_count
        var = s2 * inv_count - mean * mean
        scale = gamma_l * jax.lax.rsqrt(var + BN_EPS)
        shift = beta_l - mean * scale
        return y * scale + shift

    h1 = conv3x3(x, b1_ref)
    h1 = jnp.maximum(batchnorm(h1, g1_ref[...], be1_ref[...]), 0.0)

    h2 = conv3x3(h1, b2_ref)
    h2 = batchnorm(h2, g2_ref[...], be2_ref[...])

    # identity shortcut + relu (x stays f32, never touched the MXU)
    o_ref[...] = jnp.maximum(h2 + x, 0.0).astype(o_ref.dtype)


# ----------------------- constant-structure construction ---------------------
# NOTE: in a full model these are built once at parameter-load time (hoisted out of
# the per-call path); rebuilt here so the wrapper is a drop-in NCHW forward.
def _banded_conv_weights(w_oihw, width):
    """(Cout, Cin, 3, 3) OIHW weight -> (3, W*Cin, W*Cout) per-image banded matrices.

    Band_kh[w'*Cin + ci, w*Cout + co] = w[co, ci, kh, w'-w+1] if |w'-w| <= 1 else 0,
    so (row @ Band_kh) applies the three horizontal taps of kernel row kh; the zero
    band structure implements the left/right zero padding for free.
    """
    w_hwio = jnp.transpose(w_oihw, (2, 3, 1, 0)).astype(jnp.float32)  # (3, 3, Cin, Cout)
    cin, cout = w_hwio.shape[2], w_hwio.shape[3]
    src = jnp.arange(width)[:, None]          # w' (input pixel)
    dst = jnp.arange(width)[None, :]          # w  (output pixel)
    kw = src - dst + 1                        # horizontal tap index
    valid = (kw >= 0) & (kw <= 2)
    kw_c = jnp.clip(kw, 0, 2)

    def one(kh):
        blk = w_hwio[kh][kw_c]                                  # (W, W, Cin, Cout)
        blk = jnp.where(valid[:, :, None, None], blk, 0.0)
        return jnp.transpose(blk, (0, 2, 1, 3)).reshape(width * cin, width * cout)

    return jnp.stack([one(0), one(1), one(2)], axis=0)


def _stacked_band_weights(w_oihw, width, batch):
    """Block-diagonalize the per-image bands over the batch (lane order n, w, c) and
    stack the three kh blocks along K -> (3*N*W*Cin, N*W*Cout), shipped as bf16."""
    band3 = _banded_conv_weights(w_oihw, width)                  # (3, W*Cin, W*Cout)
    _, wcin, wcout = band3.shape
    eye_n = jnp.eye(batch, dtype=band3.dtype)
    big = jnp.einsum("kij,ab->kaibj", band3, eye_n)              # (3, N, W*Cin, N, W*Cout)
    return big.reshape(3 * batch * wcin, batch * wcout).astype(jnp.bfloat16)


# --------------------------------- wrapper -----------------------------------
def basic_block_enc_pallas(x_nchw, params):
    """x_nchw: (N, C, H, W) float32.  Returns (N, C, H, W) float32."""
    n, c, h, w = x_nchw.shape
    planes = params["conv1_w"].shape[0]
    assert planes == c, "only stride=1, scale_factor=1 (identity shortcut) supported"
    assert (n * w) & (n * w - 1) == 0, "N*W must be a power of two (roll-tree BN reduce)"
    lanes = n * w * c   # lane-dense width (128 for the test shapes)

    # Lane-dense layout: (N, C, H, W) -> (H, N, W, C) -> (H, N*W*C).  In a full model
    # activations stay in this layout between blocks (these transposes are hoisted).
    x2 = jnp.transpose(x_nchw, (2, 0, 3, 1)).astype(jnp.float32).reshape(h, lanes)

    b1 = _stacked_band_weights(params["conv1_w"], w, n)          # (3*L, L) bf16
    b2 = _stacked_band_weights(params["conv2_w"], w, n)
    g1 = jnp.tile(params["bn1_g"].astype(jnp.float32), n * w).reshape(1, lanes)
    be1 = jnp.tile(params["bn1_b"].astype(jnp.float32), n * w).reshape(1, lanes)
    g2 = jnp.tile(params["bn2_g"].astype(jnp.float32), n * w).reshape(1, lanes)
    be2 = jnp.tile(params["bn2_b"].astype(jnp.float32), n * w).reshape(1, lanes)

    vmem = pl.BlockSpec(memory_space=pltpu.MemorySpace.VMEM)
    kernel = functools.partial(_basic_block_enc_kernel,
                               channels=c, inv_count=1.0 / float(n * h * w))

    out2 = pl.pallas_call(
        kernel,
        out_shape=jax.ShapeDtypeStruct((h, lanes), jnp.float32),
        in_specs=[vmem] * 7,
        out_specs=vmem,
        scratch_shapes=[pltpu.VMEM((h, 3 * lanes), jnp.bfloat16)],
    )(x2, b1, g1, be1, b2, g2, be2)

    return jnp.transpose(out2.reshape(h, n, w, planes), (1, 3, 0, 2))


# ------------------------ pure-JAX reference (gold) ---------------------------
def _bn_train_nchw(y, gamma, beta):
    mean = jnp.mean(y, axis=(0, 2, 3), keepdims=True)
    var = jnp.mean(jnp.square(y - mean), axis=(0, 2, 3), keepdims=True)
    g = gamma.reshape(1, -1, 1, 1)
    b = beta.reshape(1, -1, 1, 1)
    return (y - mean) * jax.lax.rsqrt(var + BN_EPS) * g + b


def basic_block_enc_reference(x_nchw, params):
    dn = ("NCHW", "OIHW", "NCHW")
    conv = functools.partial(jax.lax.conv_general_dilated,
                             window_strides=(1, 1), padding=((1, 1), (1, 1)),
                             dimension_numbers=dn,
                             precision=jax.lax.Precision.HIGHEST)
    h = conv(x_nchw, params["conv1_w"])
    h = jnp.maximum(_bn_train_nchw(h, params["bn1_g"], params["bn1_b"]), 0.0)
    h = conv(h, params["conv2_w"])
    h = _bn_train_nchw(h, params["bn2_g"], params["bn2_b"])
    return jnp.maximum(h + x_nchw, 0.0)


# ------------------------------------ main ------------------------------------
if __name__ == "__main__":
    key = jax.random.PRNGKey(0)
    k_x, k_w1, k_w2, k_g1, k_b1, k_g2, k_b2 = jax.random.split(key, 7)

    N, C, H, W = 2, 4, 16, 16          # in_planes=4, stride=1, scale_factor=1 -> planes=4
    planes = C

    x = jax.random.normal(k_x, (N, C, H, W), dtype=jnp.float32)

    params = {
        "conv1_w": 0.2 * jax.random.normal(k_w1, (planes, C, 3, 3), dtype=jnp.float32),
        "conv2_w": 0.2 * jax.random.normal(k_w2, (planes, planes, 3, 3), dtype=jnp.float32),
        "bn1_g": 1.0 + 0.1 * jax.random.normal(k_g1, (planes,), dtype=jnp.float32),
        "bn1_b": 0.1 * jax.random.normal(k_b1, (planes,), dtype=jnp.float32),
        "bn2_g": 1.0 + 0.1 * jax.random.normal(k_g2, (planes,), dtype=jnp.float32),
        "bn2_b": 0.1 * jax.random.normal(k_b2, (planes,), dtype=jnp.float32),
    }

    out = jax.block_until_ready(basic_block_enc_pallas(x, params))
    ref = jax.block_until_ready(basic_block_enc_reference(x, params))

    # The only remaining precision gap vs the f32 HIGHEST reference is the bf16 rounding
    # of the conv operands on the MXU (halo + BN statistics + residual are now exact f32),
    # so diffs are well below 2e-2 on unit-scale activations; structural/indexing bugs
    # would produce O(1) diffs.
    np.testing.assert_allclose(np.asarray(out), np.asarray(ref), rtol=2e-2, atol=2e-2)
    print("KERNEL_OK")
</pallas_src>

<mosaic_0001>
module attributes {stable_mosaic.version = 11 : i64} {
  func.func @_basic_block_enc_kernel(%arg0: memref<16x128xf32, #tpu.memory_space<vmem>>, %arg1: memref<384x128xbf16, #tpu.memory_space<vmem>>, %arg2: memref<1x128xf32, #tpu.memory_space<vmem>>, %arg3: memref<1x128xf32, #tpu.memory_space<vmem>>, %arg4: memref<384x128xbf16, #tpu.memory_space<vmem>>, %arg5: memref<1x128xf32, #tpu.memory_space<vmem>>, %arg6: memref<1x128xf32, #tpu.memory_space<vmem>>, %arg7: memref<16x128xf32, #tpu.memory_space<vmem>>, %arg8: memref<16x384xbf16, #tpu.memory_space<vmem>>) attributes {dimension_semantics = [], scalar_prefetch = 0 : i64, scratch_operands = 1 : i64, tpu.core_type = #tpu.core_type<tc>} {
    %c0 = arith.constant 0 : index
    %c0_0 = arith.constant 0 : index
    %0 = vector.load %arg0[%c0, %c0_0] : memref<16x128xf32, #tpu.memory_space<vmem>>, vector<16x128xf32>
    %1 = tpu.iota {dimensions = array<i32: 0>} : vector<16x128xi32>
    %c0_i32 = arith.constant 0 : i32
    %2 = vector.broadcast %c0_i32 : i32 to vector<16x128xi32>
    %3 = arith.cmpi eq, %1, %2 : vector<16x128xi32>
    %c15_i32 = arith.constant 15 : i32
    %4 = vector.broadcast %c15_i32 : i32 to vector<16x128xi32>
    %5 = arith.cmpi eq, %1, %4 : vector<16x128xi32>
    %c1_i32 = arith.constant 1 : i32
    %6 = tpu.dynamic_rotate %0 by %c1_i32 dim 0 : vector<16x128xf32>, i32 -> vector<16x128xf32>
    %cst = arith.constant 0.000000e+00 : f32
    %7 = vector.broadcast %cst : f32 to vector<16x128xf32>
    %8 = arith.select %3, %7, %6 : vector<16x128xi1>, vector<16x128xf32>
    %c15_i32_1 = arith.constant 15 : i32
    %9 = tpu.dynamic_rotate %0 by %c15_i32_1 dim 0 : vector<16x128xf32>, i32 -> vector<16x128xf32>
    %cst_2 = arith.constant 0.000000e+00 : f32
    %10 = vector.broadcast %cst_2 : f32 to vector<16x128xf32>
    %11 = arith.select %5, %10, %9 : vector<16x128xi1>, vector<16x128xf32>
    %12 = arith.truncf %8 : vector<16x128xf32> to vector<16x128xbf16>
    %c0_3 = arith.constant 0 : index
    %c0_4 = arith.constant 0 : index
    %13 = vector.load %arg8[%c0_3, %c0_4] : memref<16x384xbf16, #tpu.memory_space<vmem>>, vector<16x128xbf16>
    tpu.vector_store %arg8[%c0_3, %c0_4], %12 {strides = array<i32>} : memref<16x384xbf16, #tpu.memory_space<vmem>>, vector<16x128xbf16>,
    %14 = arith.truncf %0 : vector<16x128xf32> to vector<16x128xbf16>
    %c0_5 = arith.constant 0 : index
    %c128 = arith.constant 128 : index
    %15 = vector.load %arg8[%c0_5, %c128] : memref<16x384xbf16, #tpu.memory_space<vmem>>, vector<16x128xbf16>
    tpu.vector_store %arg8[%c0_5, %c128], %14 {strides = array<i32>} : memref<16x384xbf16, #tpu.memory_space<vmem>>, vector<16x128xbf16>,
    %16 = arith.truncf %11 : vector<16x128xf32> to vector<16x128xbf16>
    %c0_6 = arith.constant 0 : index
    %c256 = arith.constant 256 : index
    %17 = vector.load %arg8[%c0_6, %c256] : memref<16x384xbf16, #tpu.memory_space<vmem>>, vector<16x128xbf16>
    tpu.vector_store %arg8[%c0_6, %c256], %16 {strides = array<i32>} : memref<16x384xbf16, #tpu.memory_space<vmem>>, vector<16x128xbf16>,
    %c0_7 = arith.constant 0 : index
    %c0_8 = arith.constant 0 : index
    %18 = vector.load %arg8[%c0_7, %c0_8] : memref<16x384xbf16, #tpu.memory_space<vmem>>, vector<16x384xbf16>
    %c0_9 = arith.constant 0 : index
    %c0_10 = arith.constant 0 : index
    %19 = vector.load %arg1[%c0_9, %c0_10] : memref<384x128xbf16, #tpu.memory_space<vmem>>, vector<384x128xbf16>
    %cst_11 = arith.constant dense<0.000000e+00> : vector<16x128xf32>
    %20 = tpu.matmul %18, %19, %cst_11 {dimension_numbers = #tpu.dot_dimension_numbers<[1], [0], [0], [1], [0, 0, 1, 1], [], []>} : vector<16x384xbf16>, vector<384x128xbf16>, vector<16x128xf32> -> vector<16x128xf32>
    %c0_12 = arith.constant 0 : index
    %c0_13 = arith.constant 0 : index
    %21 = vector.load %arg2[%c0_12, %c0_13] : memref<1x128xf32, #tpu.memory_space<vmem>>, vector<1x128xf32>
    %c0_14 = arith.constant 0 : index
    %c0_15 = arith.constant 0 : index
    %22 = vector.load %arg3[%c0_14, %c0_15] : memref<1x128xf32, #tpu.memory_space<vmem>>, vector<1x128xf32>
    %cst_16 = arith.constant dense<0.000000e+00> : vector<128xf32>
    %23 = vector.multi_reduction <add>, %20, %cst_16 [0] : vector<16x128xf32> to vector<128xf32>
    %24 = vector.shape_cast %23 : vector<128xf32> to vector<1x128xf32>
    %c4_i32 = arith.constant 4 : i32
    %25 = tpu.dynamic_rotate %24 by %c4_i32 dim 1 : vector<1x128xf32>, i32 -> vector<1x128xf32>
    %26 = arith.addf %24, %25 : vector<1x128xf32>
    %c8_i32 = arith.constant 8 : i32
    %27 = tpu.dynamic_rotate %26 by %c8_i32 dim 1 : vector<1x128xf32>, i32 -> vector<1x128xf32>
    %28 = arith.addf %26, %27 : vector<1x128xf32>
    %c16_i32 = arith.constant 16 : i32
    %29 = tpu.dynamic_rotate %28 by %c16_i32 dim 1 : vector<1x128xf32>, i32 -> vector<1x128xf32>
    %30 = arith.addf %28, %29 : vector<1x128xf32>
    %c32_i32 = arith.constant 32 : i32
    %31 = tpu.dynamic_rotate %30 by %c32_i32 dim 1 : vector<1x128xf32>, i32 -> vector<1x128xf32>
    %32 = arith.addf %30, %31 : vector<1x128xf32>
    %c64_i32 = arith.constant 64 : i32
    %33 = tpu.dynamic_rotate %32 by %c64_i32 dim 1 : vector<1x128xf32>, i32 -> vector<1x128xf32>
    %34 = arith.addf %32, %33 : vector<1x128xf32>
    %35 = arith.mulf %20, %20 : vector<16x128xf32>
    %cst_17 = arith.constant dense<0.000000e+00> : vector<128xf32>
    %36 = vector.multi_reduction <add>, %35, %cst_17 [0] : vector<16x128xf32> to vector<128xf32>
    %37 = vector.shape_cast %36 : vector<128xf32> to vector<1x128xf32>
    %c4_i32_18 = arith.constant 4 : i32
    %38 = tpu.dynamic_rotate %37 by %c4_i32_18 dim 1 : vector<1x128xf32>, i32 -> vector<1x128xf32>
    %39 = arith.addf %37, %38 : vector<1x128xf32>
    %c8_i32_19 = arith.constant 8 : i32
    %40 = tpu.dynamic_rotate %39 by %c8_i32_19 dim 1 : vector<1x128xf32>, i32 -> vector<1x128xf32>
    %41 = arith.addf %39, %40 : vector<1x128xf32>
    %c16_i32_20 = arith.constant 16 : i32
    %42 = tpu.dynamic_rotate %41 by %c16_i32_20 dim 1 : vector<1x128xf32>, i32 -> vector<1x128xf32>
    %43 = arith.addf %41, %42 : vector<1x128xf32>
    %c32_i32_21 = arith.constant 32 : i32
    %44 = tpu.dynamic_rotate %43 by %c32_i32_21 dim 1 : vector<1x128xf32>, i32 -> vector<1x128xf32>
    %45 = arith.addf %43, %44 : vector<1x128xf32>
    %c64_i32_22 = arith.constant 64 : i32
    %46 = tpu.dynamic_rotate %45 by %c64_i32_22 dim 1 : vector<1x128xf32>, i32 -> vector<1x128xf32>
    %47 = arith.addf %45, %46 : vector<1x128xf32>
    %cst_23 = arith.constant 0.001953125 : f32
    %48 = vector.broadcast %cst_23 : f32 to vector<1x128xf32>
    %49 = arith.mulf %34, %48 : vector<1x128xf32>
    %cst_24 = arith.constant 0.001953125 : f32
    %50 = vector.broadcast %cst_24 : f32 to vector<1x128xf32>
    %51 = arith.mulf %47, %50 : vector<1x128xf32>
    %52 = arith.mulf %49, %49 : vector<1x128xf32>
    %53 = arith.subf %51, %52 : vector<1x128xf32>
    %cst_25 = arith.constant 9.99999974E-6 : f32
    %54 = vector.broadcast %cst_25 : f32 to vector<1x128xf32>
    %55 = arith.addf %53, %54 : vector<1x128xf32>
    %56 = math.rsqrt %55 : vector<1x128xf32>
    %57 = arith.mulf %21, %56 : vector<1x128xf32>
    %58 = arith.mulf %49, %57 : vector<1x128xf32>
    %59 = arith.subf %22, %58 : vector<1x128xf32>
    %60 = vector.broadcast %57 : vector<1x128xf32> to vector<16x128xf32>
    %61 = arith.mulf %20, %60 : vector<16x128xf32>
    %62 = vector.broadcast %59 : vector<1x128xf32> to vector<16x128xf32>
    %63 = arith.addf %61, %62 : vector<16x128xf32>
    %cst_26 = arith.constant 0.000000e+00 : f32
    %64 = vector.broadcast %cst_26 : f32 to vector<16x128xf32>
    %65 = arith.maximumf %63, %64 : vector<16x128xf32>
    %c1_i32_27 = arith.constant 1 : i32
    %66 = tpu.dynamic_rotate %65 by %c1_i32_27 dim 0 : vector<16x128xf32>, i32 -> vector<16x128xf32>
    %cst_28 = arith.constant 0.000000e+00 : f32
    %67 = vector.broadcast %cst_28 : f32 to vector<16x128xf32>
    %68 = arith.select %3, %67, %66 : vector<16x128xi1>, vector<16x128xf32>
    %c15_i32_29 = arith.constant 15 : i32
    %69 = tpu.dynamic_rotate %65 by %c15_i32_29 dim 0 : vector<16x128xf32>, i32 -> vector<16x128xf32>
    %cst_30 = arith.constant 0.000000e+00 : f32
    %70 = vector.broadcast %cst_30 : f32 to vector<16x128xf32>
    %71 = arith.select %5, %70, %69 : vector<16x128xi1>, vector<16x128xf32>
    %72 = arith.truncf %68 : vector<16x128xf32> to vector<16x128xbf16>
    %c0_31 = arith.constant 0 : index
    %c0_32 = arith.constant 0 : index
    %73 = vector.load %arg8[%c0_31, %c0_32] : memref<16x384xbf16, #tpu.memory_space<vmem>>, vector<16x128xbf16>
    tpu.vector_store %arg8[%c0_31, %c0_32], %72 {strides = array<i32>} : memref<16x384xbf16, #tpu.memory_space<vmem>>, vector<16x128xbf16>,
    %74 = arith.truncf %65 : vector<16x128xf32> to vector<16x128xbf16>
    %c0_33 = arith.constant 0 : index
    %c128_34 = arith.constant 128 : index
    %75 = vector.load %arg8[%c0_33, %c128_34] : memref<16x384xbf16, #tpu.memory_space<vmem>>, vector<16x128xbf16>
    tpu.vector_store %arg8[%c0_33, %c128_34], %74 {strides = array<i32>} : memref<16x384xbf16, #tpu.memory_space<vmem>>, vector<16x128xbf16>,
    %76 = arith.truncf %71 : vector<16x128xf32> to vector<16x128xbf16>
    %c0_35 = arith.constant 0 : index
    %c256_36 = arith.constant 256 : index
    %77 = vector.load %arg8[%c0_35, %c256_36] : memref<16x384xbf16, #tpu.memory_space<vmem>>, vector<16x128xbf16>
    tpu.vector_store %arg8[%c0_35, %c256_36], %76 {strides = array<i32>} : memref<16x384xbf16, #tpu.memory_space<vmem>>, vector<16x128xbf16>,
    %c0_37 = arith.constant 0 : index
    %c0_38 = arith.constant 0 : index
    %78 = vector.load %arg8[%c0_37, %c0_38] : memref<16x384xbf16, #tpu.memory_space<vmem>>, vector<16x384xbf16>
    %c0_39 = arith.constant 0 : index
    %c0_40 = arith.constant 0 : index
    %79 = vector.load %arg4[%c0_39, %c0_40] : memref<384x128xbf16, #tpu.memory_space<vmem>>, vector<384x128xbf16>
    %cst_41 = arith.constant dense<0.000000e+00> : vector<16x128xf32>
    %80 = tpu.matmul %78, %79, %cst_41 {dimension_numbers = #tpu.dot_dimension_numbers<[1], [0], [0], [1], [0, 0, 1, 1], [], []>} : vector<16x384xbf16>, vector<384x128xbf16>, vector<16x128xf32> -> vector<16x128xf32>
    %c0_42 = arith.constant 0 : index
    %c0_43 = arith.constant 0 : index
    %81 = vector.load %arg5[%c0_42, %c0_43] : memref<1x128xf32, #tpu.memory_space<vmem>>, vector<1x128xf32>
    %c0_44 = arith.constant 0 : index
    %c0_45 = arith.constant 0 : index
    %82 = vector.load %arg6[%c0_44, %c0_45] : memref<1x128xf32, #tpu.memory_space<vmem>>, vector<1x128xf32>
    %cst_46 = arith.constant dense<0.000000e+00> : vector<128xf32>
    %83 = vector.multi_reduction <add>, %80, %cst_46 [0] : vector<16x128xf32> to vector<128xf32>
    %84 = vector.shape_cast %83 : vector<128xf32> to vector<1x128xf32>
    %c4_i32_47 = arith.constant 4 : i32
    %85 = tpu.dynamic_rotate %84 by %c4_i32_47 dim 1 : vector<1x128xf32>, i32 -> vector<1x128xf32>
    %86 = arith.addf %84, %85 : vector<1x128xf32>
    %c8_i32_48 = arith.constant 8 : i32
    %87 = tpu.dynamic_rotate %86 by %c8_i32_48 dim 1 : vector<1x128xf32>, i32 -> vector<1x128xf32>
    %88 = arith.addf %86, %87 : vector<1x128xf32>
    %c16_i32_49 = arith.constant 16 : i32
    %89 = tpu.dynamic_rotate %88 by %c16_i32_49 dim 1 : vector<1x128xf32>, i32 -> vector<1x128xf32>
    %90 = arith.addf %88, %89 : vector<1x128xf32>
    %c32_i32_50 = arith.constant 32 : i32
    %91 = tpu.dynamic_rotate %90 by %c32_i32_50 dim 1 : vector<1x128xf32>, i32 -> vector<1x128xf32>
    %92 = arith.addf %90, %91 : vector<1x128xf32>
    %c64_i32_51 = arith.constant 64 : i32
    %93 = tpu.dynamic_rotate %92 by %c64_i32_51 dim 1 : vector<1x128xf32>, i32 -> vector<1x128xf32>
    %94 = arith.addf %92, %93 : vector<1x128xf32>
    %95 = arith.mulf %80, %80 : vector<16x128xf32>
    %cst_52 = arith.constant dense<0.000000e+00> : vector<128xf32>
    %96 = vector.multi_reduction <add>, %95, %cst_52 [0] : vector<16x128xf32> to vector<128xf32>
    %97 = vector.shape_cast %96 : vector<128xf32> to vector<1x128xf32>
    %c4_i32_53 = arith.constant 4 : i32
    %98 = tpu.dynamic_rotate %97 by %c4_i32_53 dim 1 : vector<1x128xf32>, i32 -> vector<1x128xf32>
    %99 = arith.addf %97, %98 : vector<1x128xf32>
    %c8_i32_54 = arith.constant 8 : i32
    %100 = tpu.dynamic_rotate %99 by %c8_i32_54 dim 1 : vector<1x128xf32>, i32 -> vector<1x128xf32>
    %101 = arith.addf %99, %100 : vector<1x128xf32>
    %c16_i32_55 = arith.constant 16 : i32
    %102 = tpu.dynamic_rotate %101 by %c16_i32_55 dim 1 : vector<1x128xf32>, i32 -> vector<1x128xf32>
    %103 = arith.addf %101, %102 : vector<1x128xf32>
    %c32_i32_56 = arith.constant 32 : i32
    %104 = tpu.dynamic_rotate %103 by %c32_i32_56 dim 1 : vector<1x128xf32>, i32 -> vector<1x128xf32>
    %105 = arith.addf %103, %104 : vector<1x128xf32>
    %c64_i32_57 = arith.constant 64 : i32
    %106 = tpu.dynamic_rotate %105 by %c64_i32_57 dim 1 : vector<1x128xf32>, i32 -> vector<1x128xf32>
    %107 = arith.addf %105, %106 : vector<1x128xf32>
    %cst_58 = arith.constant 0.001953125 : f32
    %108 = vector.broadcast %cst_58 : f32 to vector<1x128xf32>
    %109 = arith.mulf %94, %108 : vector<1x128xf32>
    %cst_59 = arith.constant 0.001953125 : f32
    %110 = vector.broadcast %cst_59 : f32 to vector<1x128xf32>
    %111 = arith.mulf %107, %110 : vector<1x128xf32>
    %112 = arith.mulf %109, %109 : vector<1x128xf32>
    %113 = arith.subf %111, %112 : vector<1x128xf32>
    %cst_60 = arith.constant 9.99999974E-6 : f32
    %114 = vector.broadcast %cst_60 : f32 to vector<1x128xf32>
    %115 = arith.addf %113, %114 : vector<1x128xf32>
    %116 = math.rsqrt %115 : vector<1x128xf32>
    %117 = arith.mulf %81, %116 : vector<1x128xf32>
    %118 = arith.mulf %109, %117 : vector<1x128xf32>
    %119 = arith.subf %82, %118 : vector<1x128xf32>
    %120 = vector.broadcast %117 : vector<1x128xf32> to vector<16x128xf32>
    %121 = arith.mulf %80, %120 : vector<16x128xf32>
    %122 = vector.broadcast %119 : vector<1x128xf32> to vector<16x128xf32>
    %123 = arith.addf %121, %122 : vector<16x128xf32>
    %124 = arith.addf %123, %0 : vector<16x128xf32>
    %cst_61 = arith.constant 0.000000e+00 : f32
    %125 = vector.broadcast %cst_61 : f32 to vector<16x128xf32>
    %126 = arith.maximumf %124, %125 : vector<16x128xf32>
    %c0_62 = arith.constant 0 : index
    %c0_63 = arith.constant 0 : index
    %127 = vector.load %arg7[%c0_62, %c0_63] : memref<16x128xf32, #tpu.memory_space<vmem>>, vector<16x128xf32>
    tpu.vector_store %arg7[%c0_62, %c0_63], %126 {strides = array<i32>} : memref<16x128xf32, #tpu.memory_space<vmem>>, vector<16x128xf32>,
    return
  }
}

</mosaic_0001>

<bundles_post_ra>
// kernel: tpu_custom_call.1
= control target key start
LH: loop header
LB: loop body
LE: loop exit
PB: predicated region body
PF: predicated region fallthrough
CT: control target
= control target key end

     0   :  { %12 = vsyncpa [#allocation4], 0  ;;  %s1406_s0 = inlined_call_operand.hbm [shape: f32[16,128], index: 0, kind: input, shape index: {}]   ;;  %s1407_s1 = inlined_call_operand.hbm [shape: bf16[384,128], index: 1, kind: input, shape index: {}]   ;;  %s1408_s2 = inlined_call_operand.vmem [shape: f32[1,128], index: 2, kind: input, shape index: {}]   ;;  %s1409_s3 = inlined_call_operand.vmem [shape: f32[1,128], index: 3, kind: input, shape index: {}]   ;;  %s1410_s4 = inlined_call_operand.hbm [shape: bf16[384,128], index: 4, kind: input, shape index: {}]   ;;  %s1411_s5 = inlined_call_operand.vmem [shape: f32[1,128], index: 5, kind: input, shape index: {}]   ;;  %s1412_s6 = inlined_call_operand.vmem [shape: f32[1,128], index: 6, kind: input, shape index: {}]   ;;  %s1413_s7 = inlined_call_operand.hbm [shape: f32[16,128], index: 7, kind: output, shape index: {}]  }
   0x1   :  { %13 = vsyncpa [#allocation7], 0 }
   0x2   :  { %14 = vsyncpa [#allocation5], 0  ;;  %s1169_s24 = smov [#allocation6]   ;;  %s1075_s28 = scalar_lea.hbm %s1407_s1, 3072 }
   0x3   :  { %s32_s25 = sshll.u32 %s1169_s24, 4  ;;  %p1076_p0 = scmp.ne.s32.totalorder %s1407_s1, %s1075_s28  ;;  %s33_s25 = int_to_ptr.vmem [resolvable:$true] %s32_s25 }
   0x4   :  { %p1079_p1 = scmp.lt.u32.totalorder %s1075_s28, %s1407_s1 }
   0x6   :  { %p1081_p2 = pnand %p1079_p1, %p1076_p0 }
   0x8   :  { %1084 = shalt.err (!%p1081_p2)
}
   0x9   :  { %s1085_s10 = scalar_lea.vmem %s33_s25, 3072  ;;  %p1090_p4 = scmp.lt.s32.totalorder %s33_s25, %s33_s25 }
   0xa   :  { %p1086_p3 = scmp.ne.s32.totalorder %s33_s25, %s1085_s10  ;;  %p1091_p5 = scmp.lt.s32.totalorder %s1085_s10, %s1085_s10 }
   0xc   :  { %p1092_p6 = por %p1091_p5, %p1090_p4 }
   0xe   :  { %p1093_p7 = pnand %p1092_p6, %p1086_p3 }
  0x10   :  { %1096 = shalt.err (!%p1093_p7)
}
  0x11   :  { %s1170_s11 = smov 64   ;;  %s1171_s12 = smov 4  }
  0x12   :  { %38 = dma.hbm_to_vmem [thread:$0]  %s1407_s1, 3072, %s33_s25, [#allocation7], %s1170_s11, %s1170_s11, %s1171_s12  }
  0x13   :  { %s1172_s15 = smov [#allocation3]   ;;  %s1097_s19 = scalar_lea.hbm %s1406_s0, 256 }
  0x14   :  { %s20_s16 = sshll.u32 %s1172_s15, 4  ;;  %p1098_p8 = scmp.ne.s32.totalorder %s1406_s0, %s1097_s19  ;;  %s21_s16 = int_to_ptr.vmem [resolvable:$true] %s20_s16 }
  0x15   :  { %p1101_p9 = scmp.lt.u32.totalorder %s1097_s19, %s1406_s0 }
  0x17   :  { %p1103_p10 = pnand %p1101_p9, %p1098_p8 }
  0x19   :  { %1106 = shalt.err (!%p1103_p10)
}
  0x1a   :  { %s1107_s24 = scalar_lea.vmem %s21_s16, 256  ;;  %p1112_p12 = scmp.lt.s32.totalorder %s21_s16, %s21_s16 }
  0x1b   :  { %p1108_p11 = scmp.ne.s32.totalorder %s21_s16, %s1107_s24  ;;  %p1113_p13 = scmp.lt.s32.totalorder %s1107_s24, %s1107_s24 }
  0x1d   :  { %p1114_p0 = por %p1113_p13, %p1112_p12 }
  0x1f   :  { %p1115_p1 = pnand %p1114_p0, %p1108_p11 }
  0x21   :  { %1118 = shalt.err (!%p1115_p1)
}
  0x22   :  { %s1173_s1 = smov 128   ;;  %s1174_s25 = smov 8  }
  0x23   :  { %26 = dma.hbm_to_vmem [thread:$0]  %s1406_s0, 256, %s21_s16, [#allocation4], %s1173_s1, %s1173_s1, %s1174_s25  }
  0x24   :  { %s1175_s28 = smov [#allocation8]   ;;  %s1119_s9 = scalar_lea.hbm %s1410_s4, 3072 }
  0x25   :  { %s48_s29 = sshll.u32 %s1175_s28, 4  ;;  %p1120_p2 = scmp.ne.s32.totalorder %s1410_s4, %s1119_s9  ;;  %s49_s29 = int_to_ptr.vmem [resolvable:$true] %s48_s29 }
  0x26   :  { %p1123_p3 = scmp.lt.u32.totalorder %s1119_s9, %s1410_s4 }
  0x28   :  { %p1125_p4 = pnand %p1123_p3, %p1120_p2 }
  0x2a   :  { %1128 = shalt.err (!%p1125_p4)
}
  0x2b   :  { %s1129_s17 = scalar_lea.vmem %s49_s29, 3072  ;;  %p1134_p6 = scmp.lt.s32.totalorder %s49_s29, %s49_s29 }
  0x2c   :  { %p1130_p5 = scmp.ne.s32.totalorder %s49_s29, %s1129_s17  ;;  %p1135_p7 = scmp.lt.s32.totalorder %s1129_s17, %s1129_s17 }
  0x2e   :  { %p1136_p8 = por %p1135_p7, %p1134_p6 }
  0x30   :  { %p1137_p9 = pnand %p1136_p8, %p1130_p5 }
  0x32   :  { %1140 = shalt.err (!%p1137_p9)
}
  0x33   :  { %54 = dma.hbm_to_vmem [thread:$0]  %s1410_s4, 3072, %s49_s29, [#allocation7], %s1170_s11, %s1170_s11, %s1171_s12  }
  0x34   :  { %1163 = dma.done.wait [#allocation4], 256  }
  0x35   :  { %1164 = vsyncadd [#allocation4], 4294967040 }
  0x36   :  { %1165 = dma.done.wait [#allocation7], 6144  }
  0x37   :  { %1166 = vsyncadd [#allocation7], 4294961152  ;;  %v71_v0 = vlaneseq  ;;  %v1176_v1 = vmov 0.0   ;;  %vm1177_vm0 = vmmov 0   ;;  %v1023_v4 = vld [vmem:[#allocation6 + $0x40] sm:$0xff]   ;;  %v1026_v7 = vld [vmem:[#allocation6 + $0x48] sm:$0xff]  }
  0x38   :  { %968 = vmatprep.subr.bf16.mxu1 %v1176_v1  ;;  %984 = vmatprep.mubr.msk.bf16.mxu1 %vm1177_vm0, %v1176_v1  ;;  %v1024_v5 = vld [vmem:[#allocation6] sm:$0xff]   ;;  %v1027_v8 = vld [vmem:[#allocation6 + $0x8] sm:$0xff]   ;;  %v1029_v10 = vld [vmem:[#allocation6 + $0x50] sm:$0xff]   ;;  %vm1178_vm3 = vmmov 1   ;;  %s1179_s4 = smov 16   ;;  %s1180_s18 = smov 32  }
  0x39   :  { %v1270_v2 = vshrl.u32 %v71_v0, 7  ;;  %906 = vmatprep.subr.bf16.mxu0 %v1023_v4  ;;  %v1025_v6 = vld [vmem:[#allocation6 + $0x80] sm:$0xff]   ;;  %v1028_v9 = vld [vmem:[#allocation6 + $0x88] sm:$0xff]   ;;  %v1030_v11 = vld [vmem:[#allocation6 + $0x10] sm:$0xff]  }
  0x3a   :  { %907 = vmatpush3.bf16.msra.mxu0 %v1024_v5  ;;  %969 = vmatpush3.bf16.msra.mxu1 %v1025_v6  ;;  %v1031_v12 = vld [vmem:[#allocation6 + $0x90] sm:$0xff]   ;;  %v1032_v13 = vld [vmem:[#allocation6 + $0x58] sm:$0xff]   ;;  %v1035_v16 = vld [vmem:[#allocation6 + $0x60] sm:$0xff]  }
  0x3b   :  { %v73_v3 = vadd.s32 8, %v1270_v2  ;;  %908 = vmatprep.subr.bf16.mxu0 %v1026_v7  ;;  %970 = vmatprep.subr.bf16.mxu1 %v1176_v1  ;;  %v1033_v14 = vld [vmem:[#allocation6 + $0x18] sm:$0xff]   ;;  %v1036_v17 = vld [vmem:[#allocation6 + $0x20] sm:$0xff]   ;;  %v1038_v19 = vld [vmem:[#allocation6 + $0x68] sm:$0xff]   ;;  %vm1008_vm1 = vcmp.ne.s32.totalorder %v1270_v2, 0  ;;  %vm80_vm5 = vcmp.lt.s32.totalorder %v1270_v2, 1 }
  0x3c   :  { %v1034_v15 = vld [vmem:[#allocation6 + $0x98] sm:$0xff]   ;;  %v1037_v18 = vld [vmem:[#allocation6 + $0xa0] sm:$0xff]   ;;  %v1039_v20 = vld [vmem:[#allocation6 + $0x28] sm:$0xff]   ;;  %vm87_vm6 = vcmp.lt.s32.totalorder %v1270_v2, 7 }
  0x3d   :  { %v1040_v21 = vld [vmem:[#allocation6 + $0xa8] sm:$0xff]   ;;  %v1041_v22 = vld [vmem:[#allocation6 + $0x70] sm:$0xff]   ;;  %vm1009_vm2 = vcmp.ne.s32.totalorder %v73_v3, 15  ;;  %vm1280_vm4 = vmpackc.low %vm1178_vm3, %vm1008_vm1 }
  0x3e   :  { %909 = vmatpush3.bf16.msra.mxu0 %v1027_v8  ;;  %971 = vmatpush3.bf16.msra.mxu1 %v1028_v9  ;;  %v1042_v23 = vld [vmem:[#allocation6 + $0x30] sm:$0xff]   ;;  %v1044_v26 = vld [vmem:[#allocation6 + $0x78] sm:$0xff]   ;;  %vm1297_vm7 = vmpackc.low %vm1009_vm2, %vm1178_vm3 }
  0x3f   :  { %910 = vmatprep.subr.bf16.mxu0 %v1029_v10  ;;  %972 = vmatprep.subr.bf16.mxu1 %v1176_v1  ;;  %v1043_v24 = vld [vmem:[#allocation6 + $0xb0] sm:$0xff]   ;;  %v1286_v28 = vld [vmem:[#allocation3 + $0x8] sm:$0xff] }
  0x40   :  { %v1284_v27 = vld [vmem:[#allocation3] sm:$0xff]  ;;  %v1045_v29 = vld [vmem:[#allocation6 + $0x38] sm:$0xff]   ;;  %v79_v31 = vrot.slane %v1286_v28, 7  ;;  %v86_v33 = vrot.slane %v1286_v28, 1 }
  0x41   :  { %v78_v30 = vrot.slane %v1284_v27, 7  ;;  %v85_v32 = vrot.slane %v1284_v27, 1  ;;  %v1046_v35 = vld [vmem:[#allocation6 + $0xb8] sm:$0xff]   ;;  %v94_v36 = vpack.c.bf16 %v1286_v28, %v1284_v27 }
  0x42   :  { %911 = vmatpush3.bf16.msra.mxu0 %v1030_v11  ;;  %973 = vmatpush3.bf16.msra.mxu1 %v1031_v12 }
  0x43   :  { %912 = vmatprep.subr.bf16.mxu0 %v1032_v13  ;;  %974 = vmatprep.subr.bf16.mxu1 %v1176_v1  ;;  %v81_v37 = vsel %vm80_vm5, %v78_v30, %v79_v31  ;;  %v82_v38 = vsel %vm80_vm5, %v79_v31, %v78_v30  ;;  %v88_v39 = vsel %vm87_vm6, %v85_v32, %v86_v33  ;;  %v1051_v30 = vld [vmem:[#allocation8 + $0x8] sm:$0xff]  }
  0x44   :  { %v89_v40 = vsel %vm87_vm6, %v86_v33, %v85_v32  ;;  %325 = vmatprep.mubr.bf16.mxu0 %v94_v36  ;;  %v892_v41 = vpack.c.bf16 %v81_v37, %v82_v38  ;;  %v1052_v31 = vld [vmem:[#allocation8 + $0x88] sm:$0xff]   ;;  %v1053_v32 = vld [vmem:[#allocation8 + $0x50] sm:$0xff]   ;;  %v1056_v38 = vld [vmem:[#allocation8 + $0x58] sm:$0xff]  }
  0x45   :  { %v896_v42 = vpack.c.bf16 %v89_v40, %v88_v39  ;;  %v1055_v36 = vld [vmem:[#allocation8 + $0x90] sm:$0xff]   ;;  %v1057_v39 = vld [vmem:[#allocation8 + $0x18] sm:$0xff]  }
  0x46   :  { %913 = vmatpush3.bf16.msra.mxu0 %v1033_v14  ;;  %975 = vmatpush3.bf16.msra.mxu1 %v1034_v15  ;;  %v1058_v40 = vld [vmem:[#allocation8 + $0x98] sm:$0xff]  }
  0x47   :  { %914 = vmatprep.subr.bf16.mxu0 %v1035_v16  ;;  %976 = vmatprep.subr.bf16.mxu1 %v1176_v1 }
  0x4a   :  { %915 = vmatpush3.bf16.msra.mxu0 %v1036_v17  ;;  %977 = vmatpush3.bf16.msra.mxu1 %v1037_v18 }
  0x4b   :  { %916 = vmatprep.subr.bf16.mxu0 %v1038_v19  ;;  %978 = vmatprep.subr.bf16.mxu1 %v1176_v1 }
  0x4e   :  { %917 = vmatpush3.bf16.msra.mxu0 %v1039_v20  ;;  %979 = vmatpush3.bf16.msra.mxu1 %v1040_v21  ;;  %v1047_v21 = vld [vmem:[#allocation8 + $0x40] sm:$0xff]  }
  0x4f   :  { %918 = vmatprep.subr.bf16.mxu0 %v1041_v22  ;;  %980 = vmatprep.subr.bf16.mxu1 %v1176_v1  ;;  %v1048_v22 = vld [vmem:[#allocation8] sm:$0xff]  }
  0x52   :  { %919 = vmatpush3.bf16.msra.mxu0 %v1042_v23  ;;  %981 = vmatpush3.bf16.msra.mxu1 %v1043_v24  ;;  %v1049_v23 = vld [vmem:[#allocation8 + $0x80] sm:$0xff]  }
  0x53   :  { %920 = vmatprep.subr.bf16.mxu0 %v1044_v26  ;;  %982 = vmatprep.subr.bf16.mxu1 %v1176_v1 }
  0x56   :  { %921 = vmatpush3.bf16.msra.mxu0 %v1045_v29  ;;  %983 = vmatpush3.bf16.msra.mxu1 %v1046_v35  ;;  %v1050_v29 = vld [vmem:[#allocation8 + $0x48] sm:$0xff]   ;;  %v1054_v35 = vld [vmem:[#allocation8 + $0x10] sm:$0xff]  }
  0x57   :  { %988 = vmatprep.subr.bf16.mxu1 %v1176_v1  ;;  %937 = vmatprep.subr.bf16.mxu0 %v1047_v21 }
  0x59   :  { %893 = vmatmul.mubr.msk.bf16.vlgmr.msra.gmra.mrb[0].mxu0 %vm1280_vm4, %v892_v41  ;;  %985 = vmatmul.mubr.msk.bf16.vlgmr.msra.gmra.mrb[0].mxu1 %vm1297_vm7, %v896_v42  ;;  %v1059_v41 = vld [vmem:[#allocation8 + $0x60] sm:$0xff]  }
  0x5a   :  { %1004 = vmatprep.mubr.msk.bf16.mxu1 %vm1177_vm0, %v1176_v1  ;;  %938 = vmatpush3.bf16.msra.mxu0 %v1048_v22  ;;  %v1060_v42 = vld [vmem:[#allocation8 + $0x20] sm:$0xff]  }
  0x5b   :  { %989 = vmatpush3.bf16.msra.mxu1 %v1049_v23  ;;  %939 = vmatprep.subr.bf16.mxu0 %v1050_v29 }
  0x5c   :  { %990 = vmatprep.subr.bf16.mxu1 %v1176_v1 }
  0x5e   :  { %940 = vmatpush3.bf16.msra.mxu0 %v1051_v30 }
  0x5f   :  { %991 = vmatpush3.bf16.msra.mxu1 %v1052_v31  ;;  %941 = vmatprep.subr.bf16.mxu0 %v1053_v32 }
  0x60   :  { %992 = vmatprep.subr.bf16.mxu1 %v1176_v1 }
  0x62   :  { %942 = vmatpush3.bf16.msra.mxu0 %v1054_v35 }
  0x63   :  { %993 = vmatpush3.bf16.msra.mxu1 %v1055_v36  ;;  %943 = vmatprep.subr.bf16.mxu0 %v1056_v38 }
  0x64   :  { %994 = vmatprep.subr.bf16.mxu1 %v1176_v1 }
  0x66   :  { %944 = vmatpush3.bf16.msra.mxu0 %v1057_v39 }
  0x67   :  { %995 = vmatpush3.bf16.msra.mxu1 %v1058_v40  ;;  %945 = vmatprep.subr.bf16.mxu0 %v1059_v41 }
  0x68   :  { %996 = vmatprep.subr.bf16.mxu1 %v1176_v1 }
  0x6a   :  { %946 = vmatpush3.bf16.msra.mxu0 %v1060_v42 }
 0x12c   :  { %v922_v43 = vpop.f32.mrb[0].mxu0  ;;  %v368_v44 = vpop.f32.mrb[0].mxu1 }
 0x12d   :  { %v923_v45 = vpop.f32.mrb[1].mxu0  ;;  %v986_v47 = vpop.f32.mrb[1].mxu1 }
 0x12e   :  { %v924_v46 = vadd.f32 %v923_v45, %v922_v43  ;;  %v925_v48 = vpop.f32.mrb[2].mxu0  ;;  %v371_v49 = vpop.f32.mrb[2].mxu1  ;;  %v1061_v43 = vld [vmem:[#allocation8 + $0xa0] sm:$0xff]   ;;  %v1063_v45 = vld [vmem:[#allocation8 + $0x28] sm:$0xff]   ;;  %v1065_v47 = vld [vmem:[#allocation8 + $0x70] sm:$0xff]  }
 0x12f   :  { %v926_v50 = vpop.f32.mrb[3].mxu0  ;;  %v987_v53 = vpop.f32.mrb[3].mxu1  ;;  %997 = vmatpush3.bf16.msra.mxu1 %v1061_v43 }
 0x130   :  { %v1319_v51 = vadd.f32 %v924_v46, %v368_v44  ;;  %v927_v52 = vadd.f32 %v926_v50, %v925_v48  ;;  %v1062_v44 = vld [vmem:[#allocation8 + $0x68] sm:$0xff]   ;;  %998 = vmatprep.subr.bf16.mxu1 %v1176_v1  ;;  %v1066_v48 = vld [vmem:[#allocation8 + $0x30] sm:$0xff]   ;;  %v1068_v50 = vld [vmem:[#allocation8 + $0x78] sm:$0xff]  }
 0x131   :  { %v1064_v46 = vld [vmem:[#allocation8 + $0xa8] sm:$0xff]   ;;  %947 = vmatprep.subr.bf16.mxu0 %v1062_v44  ;;  %v1070_v53 = vld [vmem:[#allocation8 + $0xb8] sm:$0xff]  }
 0x132   :  { %v1321_v54 = vadd.f32 %v927_v52, %v371_v49  ;;  %v399_v55 = vmul.f32 %v1319_v51, %v1319_v51  ;;  %948 = vmatpush3.bf16.msra.mxu0 %v1063_v45  ;;  %v1067_v49 = vld [vmem:[#allocation8 + $0xb0] sm:$0xff]   ;;  %v1069_v52 = vld [vmem:[#allocation8 + $0x38] sm:$0xff]  }
 0x133   :  { %999 = vmatpush3.bf16.msra.mxu1 %v1064_v46  ;;  %949 = vmatprep.subr.bf16.mxu0 %v1065_v47 }
 0x134   :  { %v377_v56 = vadd.f32 %v1321_v54, %v1319_v51  ;;  %v400_v57 = vmul.f32 %v1321_v54, %v1321_v54  ;;  %1000 = vmatprep.subr.bf16.mxu1 %v1176_v1 }
 0x136   :  { %v378_v58 = vrot.slane %v377_v56, 4  ;;  %v401_v59 = vadd.f32 %v400_v57, %v399_v55  ;;  %950 = vmatpush3.bf16.msra.mxu0 %v1066_v48 }
 0x137   :  { %1001 = vmatpush3.bf16.msra.mxu1 %v1067_v49  ;;  %951 = vmatprep.subr.bf16.mxu0 %v1068_v50 }
 0x138   :  { %v379_v60 = vadd.f32 %v378_v58, %v377_v56  ;;  %v402_v61 = vrot.slane %v401_v59, 4  ;;  %1002 = vmatprep.subr.bf16.mxu1 %v1176_v1 }
 0x13a   :  { %v380_v62 = vrot.slane %v379_v60, 2  ;;  %v403_v63 = vadd.f32 %v402_v61, %v401_v59  ;;  %952 = vmatpush3.bf16.msra.mxu0 %v1069_v52 }
 0x13b   :  { %1003 = vmatpush3.bf16.msra.mxu1 %v1070_v53 }
 0x13c   :  { %v381_v0 = vadd.f32 %v380_v62, %v379_v60  ;;  %v404_v3 = vrot.slane %v403_v63, 2 }
 0x13e   :  { %v382_v4 = vrot.slane %v381_v0, 1  ;;  %v405_v5 = vadd.f32 %v404_v3, %v403_v63  ;;  %v1350_v3 = vsub.s32 0, %v1270_v2 }
 0x140   :  { %v383_v6 = vadd.f32 %v382_v4, %v381_v0  ;;  %v406_v7 = vrot.slane %v405_v5, 1  ;;  %v375_v0 = vld [vmem:[%s1408_s2] sm:$0x1] }
 0x142   :  { %384 = vrot.lane.b32.xlu0 %v383_v6, %s1171_s12  ;;  %v407_v8 = vadd.f32 %v406_v7, %v405_v5  ;;  %v376_v5 = vld [vmem:[%s1409_s3] sm:$0x1] }
 0x146   :  { %408 = vrot.lane.b32.xlu0 %v407_v8, %s1171_s12 }
 0x1b4   :  { %v385_v9 = vpop.permute.xlu0 %384 }
 0x1b5   :  { %v386_v10 = vadd.f32 %v385_v9, %v383_v6 }
 0x1b7   :  { %387 = vrot.lane.b32.xlu1 %v386_v10, %s1174_s25 }
 0x1b8   :  { %v409_v11 = vpop.permute.xlu0 %408 }
 0x1b9   :  { %v410_v12 = vadd.f32 %v409_v11, %v407_v8 }
 0x1bb   :  { %411 = vrot.lane.b32.xlu1 %v410_v12, %s1174_s25 }
 0x229   :  { %v388_v13 = vpop.permute.xlu1 %387 }
 0x22a   :  { %v389_v14 = vadd.f32 %v388_v13, %v386_v10 }
 0x22c   :  { %390 = vrot.lane.b32.xlu0 %v389_v14, %s1179_s4 }
 0x22d   :  { %v412_v15 = vpop.permute.xlu1 %411 }
 0x22e   :  { %v413_v16 = vadd.f32 %v412_v15, %v410_v12 }
 0x230   :  { %414 = vrot.lane.b32.xlu1 %v413_v16, %s1179_s4 }
 0x29e   :  { %v391_v17 = vpop.permute.xlu0 %390 }
 0x29f   :  { %v392_v18 = vadd.f32 %v391_v17, %v389_v14 }
 0x2a1   :  { %393 = vrot.lane.b32.xlu0 %v392_v18, %s1180_s18 }
 0x2a2   :  { %v415_v19 = vpop.permute.xlu1 %414 }
 0x2a3   :  { %v416_v20 = vadd.f32 %v415_v19, %v413_v16 }
 0x2a5   :  { %417 = vrot.lane.b32.xlu1 %v416_v20, %s1180_s18 }
 0x313   :  { %v394_v24 = vpop.permute.xlu0 %393 }
 0x314   :  { %v395_v26 = vadd.f32 %v394_v24, %v392_v18 }
 0x316   :  { %396 = vrot.lane.b32.xlu0 %v395_v26, %s1170_s11 }
 0x317   :  { %v418_v33 = vpop.permute.xlu1 %417 }
 0x318   :  { %v419_v37 = vadd.f32 %v418_v33, %v416_v20 }
 0x31a   :  { %420 = vrot.lane.b32.xlu1 %v419_v37, %s1170_s11 }
 0x388   :  { %v397_v55 = vpop.permute.xlu0 %396 }
 0x389   :  { %v398_v56 = vadd.f32 %v397_v55, %v395_v26 }
 0x38b   :  { %v423_v57 = vmul.f32 0.001953125, %v398_v56 }
 0x38c   :  { %v421_v58 = vpop.permute.xlu1 %420 }
 0x38d   :  { %v422_v59 = vadd.f32 %v421_v58, %v419_v37  ;;  %v425_v60 = vmul.f32 %v423_v57, %v423_v57 }
 0x38f   :  { %v424_v61 = vmul.f32 0.001953125, %v422_v59 }
 0x391   :  { %v426_v62 = vsub.f32 %v424_v61, %v425_v60 }
 0x393   :  { %v427_v63 = vadd.f32 1e-05, %v426_v62 }
 0x395   :  { %1071 = vrsqrt.f32 %v427_v63 }
 0x39f   :  { %v1072_v1 = vpop.eup %1071 }
 0x3a0   :  { %v429_v4 = vmul.f32 %v1072_v1, %v375_v0 }
 0x3a2   :  { %v430_v6 = vmul.f32 %v429_v4, %v423_v57  ;;  %v436_v7 = vrot.slane %v429_v4, %v1350_v3 }
 0x3a4   :  { %v431_v8 = vsub.f32 %v376_v5, %v430_v6  ;;  %v438_v9 = vmul.f32 %v436_v7, %v1319_v51  ;;  %v439_v10 = vmul.f32 %v436_v7, %v1321_v54 }
 0x3a6   :  { %v444_v11 = vrot.slane %v431_v8, %v1350_v3 }
 0x3a8   :  { %v446_v12 = vadd.f32 %v444_v11, %v438_v9  ;;  %v447_v13 = vadd.f32 %v444_v11, %v439_v10 }
 0x3aa   :  { %v448_v14 = vmax.f32 %v446_v12, 0.0  ;;  %v449_v15 = vmax.f32 %v447_v13, 0.0 }
 0x3ac   :  { %v450_v16 = vrot.slane %v448_v14, 7  ;;  %v451_v17 = vrot.slane %v449_v15, 7  ;;  %v456_v18 = vrot.slane %v448_v14, 1  ;;  %v457_v19 = vrot.slane %v449_v15, 1 }
 0x3ad   :  { %v464_v20 = vpack.c.bf16 %v449_v15, %v448_v14 }
 0x3ae   :  { %v452_v21 = vsel %vm80_vm5, %v450_v16, %v451_v17  ;;  %v453_v22 = vsel %vm80_vm5, %v451_v17, %v450_v16  ;;  %v458_v51 = vsel %vm87_vm6, %v456_v18, %v457_v19  ;;  %v459_v54 = vsel %vm87_vm6, %v457_v19, %v456_v18  ;;  %v745_v19 = vld [vmem:[%s1411_s5] sm:$0x1] }
 0x3af   :  { %695 = vmatprep.mubr.bf16.mxu0 %v464_v20  ;;  %v900_v23 = vpack.c.bf16 %v452_v21, %v453_v22  ;;  %v904_v24 = vpack.c.bf16 %v459_v54, %v458_v51  ;;  %v746_v22 = vld [vmem:[%s1412_s6] sm:$0x1] }
 0x3b1   :  { %901 = vmatmul.mubr.msk.bf16.vlgmr.msra.gmra.mrb[4].mxu0 %vm1280_vm4, %v900_v23  ;;  %1005 = vmatmul.mubr.msk.bf16.vlgmr.msra.gmra.mrb[4].mxu1 %vm1297_vm7, %v904_v24 }
 0x484   :  { %v953_v26 = vpop.f32.mrb[4].mxu0  ;;  %v738_v29 = vpop.f32.mrb[4].mxu1 }
 0x485   :  { %v954_v30 = vpop.f32.mrb[5].mxu0  ;;  %v1006_v31 = vpop.f32.mrb[5].mxu1 }
 0x486   :  { %v955_v32 = vadd.f32 %v954_v30, %v953_v26  ;;  %v956_v33 = vpop.f32.mrb[6].mxu0  ;;  %v741_v35 = vpop.f32.mrb[6].mxu1 }
 0x487   :  { %v957_v36 = vpop.f32.mrb[7].mxu0  ;;  %v1007_v37 = vpop.f32.mrb[7].mxu1 }
 0x488   :  { %v739_v2 = vadd.f32 %v955_v32, %v738_v29  ;;  %v958_v38 = vadd.f32 %v957_v36, %v956_v33 }
 0x48a   :  { %v742_v39 = vadd.f32 %v958_v38, %v741_v35  ;;  %v769_v40 = vmul.f32 %v739_v2, %v739_v2 }
 0x48c   :  { %v747_v41 = vadd.f32 %v742_v39, %v739_v2  ;;  %v770_v42 = vmul.f32 %v742_v39, %v742_v39 }
 0x48e   :  { %v748_v25 = vrot.slane %v747_v41, 4  ;;  %v771_v43 = vadd.f32 %v770_v42, %v769_v40 }
 0x490   :  { %v749_v44 = vadd.f32 %v748_v25, %v747_v41  ;;  %v772_v34 = vrot.slane %v771_v43, 4 }
 0x492   :  { %v750_v45 = vrot.slane %v749_v44, 2  ;;  %v773_v46 = vadd.f32 %v772_v34, %v771_v43 }
 0x494   :  { %v751_v47 = vadd.f32 %v750_v45, %v749_v44  ;;  %v774_v48 = vrot.slane %v773_v46, 2 }
 0x496   :  { %v752_v49 = vrot.slane %v751_v47, 1  ;;  %v775_v50 = vadd.f32 %v774_v48, %v773_v46 }
 0x498   :  { %v753_v52 = vadd.f32 %v752_v49, %v751_v47  ;;  %v776_v53 = vrot.slane %v775_v50, 1 }
 0x49a   :  { %754 = vrot.lane.b32.xlu0 %v753_v52, %s1171_s12  ;;  %v777_v55 = vadd.f32 %v776_v53, %v775_v50 }
 0x49c   :  { %778 = vrot.lane.b32.xlu1 %v777_v55, %s1171_s12 }
 0x50c   :  { %v755_v56 = vpop.permute.xlu0 %754 }
 0x50d   :  { %v756_v57 = vadd.f32 %v755_v56, %v753_v52 }
 0x50e   :  { %v779_v58 = vpop.permute.xlu1 %778 }
 0x50f   :  { %v780_v59 = vadd.f32 %v779_v58, %v777_v55  ;;  %757 = vrot.lane.b32.xlu0 %v756_v57, %s1174_s25 }
 0x511   :  { %781 = vrot.lane.b32.xlu1 %v780_v59, %s1174_s25 }
 0x581   :  { %v758_v60 = vpop.permute.xlu0 %757 }
 0x582   :  { %v759_v61 = vadd.f32 %v758_v60, %v756_v57 }
 0x583   :  { %v782_v62 = vpop.permute.xlu1 %781 }
 0x584   :  { %v783_v63 = vadd.f32 %v782_v62, %v780_v59  ;;  %760 = vrot.lane.b32.xlu0 %v759_v61, %s1179_s4 }
 0x586   :  { %784 = vrot.lane.b32.xlu1 %v783_v63, %s1179_s4 }
 0x5f6   :  { %v761_v0 = vpop.permute.xlu0 %760 }
 0x5f7   :  { %v762_v1 = vadd.f32 %v761_v0, %v759_v61 }
 0x5f8   :  { %v785_v4 = vpop.permute.xlu1 %784 }
 0x5f9   :  { %v786_v5 = vadd.f32 %v785_v4, %v783_v63  ;;  %763 = vrot.lane.b32.xlu0 %v762_v1, %s1180_s18 }
 0x5fb   :  { %787 = vrot.lane.b32.xlu1 %v786_v5, %s1180_s18 }
 0x66b   :  { %v764_v6 = vpop.permute.xlu0 %763 }
 0x66c   :  { %v765_v7 = vadd.f32 %v764_v6, %v762_v1 }
 0x66d   :  { %v788_v8 = vpop.permute.xlu1 %787 }
 0x66e   :  { %v789_v9 = vadd.f32 %v788_v8, %v786_v5  ;;  %766 = vrot.lane.b32.xlu0 %v765_v7, %s1170_s11 }
 0x670   :  { %790 = vrot.lane.b32.xlu1 %v789_v9, %s1170_s11  ;;  %s1181_s11 = smov [#allocation9]  }
 0x671   :  { %s829_s24 = sshll.u32 %s1181_s11, 4  ;;  %s830_s24 = int_to_ptr.vmem [resolvable:$true] %s829_s24 }
 0x672   :  { %s1141_s5 = scalar_lea.vmem %s830_s24, 256  ;;  %p1146_p11 = scmp.lt.s32.totalorder %s830_s24, %s830_s24 }
 0x673   :  { %p1142_p10 = scmp.ne.s32.totalorder %s830_s24, %s1141_s5  ;;  %p1147_p12 = scmp.lt.s32.totalorder %s1141_s5, %s1141_s5 }
 0x675   :  { %p1148_p13 = por %p1147_p12, %p1146_p11 }
 0x677   :  { %p1149_p0 = pnand %p1148_p13, %p1142_p10 }
 0x6e0   :  { %v767_v10 = vpop.permute.xlu0 %766 }
 0x6e1   :  { %v768_v11 = vadd.f32 %v767_v10, %v765_v7 }
 0x6e2   :  { %v791_v12 = vpop.permute.xlu1 %790 }
 0x6e3   :  { %v793_v13 = vmul.f32 0.001953125, %v768_v11  ;;  %v792_v14 = vadd.f32 %v791_v12, %v789_v9 }
 0x6e5   :  { %v795_v15 = vmul.f32 %v793_v13, %v793_v13  ;;  %v794_v16 = vmul.f32 0.001953125, %v792_v14 }
 0x6e7   :  { %v796_v17 = vsub.f32 %v794_v16, %v795_v15 }
 0x6e9   :  { %v797_v18 = vadd.f32 1e-05, %v796_v17 }
 0x6eb   :  { %1073 = vrsqrt.f32 %v797_v18 }
 0x6f5   :  { %v1074_v20 = vpop.eup %1073 }
 0x6f6   :  { %v799_v21 = vmul.f32 %v1074_v20, %v745_v19 }
 0x6f8   :  { %v800_v51 = vmul.f32 %v799_v21, %v793_v13  ;;  %v806_v54 = vrot.slane %v799_v21, %v1350_v3 }
 0x6fa   :  { %v801_v23 = vsub.f32 %v746_v22, %v800_v51  ;;  %v808_v24 = vmul.f32 %v806_v54, %v739_v2  ;;  %v809_v26 = vmul.f32 %v806_v54, %v742_v39 }
 0x6fc   :  { %v814_v29 = vrot.slane %v801_v23, %v1350_v3 }
 0x6fe   :  { %v816_v30 = vadd.f32 %v814_v29, %v808_v24  ;;  %v817_v31 = vadd.f32 %v814_v29, %v809_v26 }
 0x700   :  { %v818_v32 = vadd.f32 %v816_v30, %v1284_v27  ;;  %v819_v33 = vadd.f32 %v817_v31, %v1286_v28 }
 0x702   :  { %v820_v35 = vmax.f32 %v818_v32, 0.0  ;;  %v821_v36 = vmax.f32 %v819_v33, 0.0 }
 0x704   :  { %822 = vst [vmem:[#allocation9] sm:$0xff] %v820_v35  ;;  %823 = vst [vmem:[#allocation9 + $0x8] sm:$0xff] %v821_v36 }
 0x705   :  { %1152 = shalt.err (!%p1149_p0)
}
 0x706   :  { %s1153_s27 = scalar_lea.hbm %s1413_s7, 256 }
 0x707   :  { %p1154_p1 = scmp.ne.s32.totalorder %s1413_s7, %s1153_s27  ;;  %p1157_p2 = scmp.lt.u32.totalorder %s1153_s27, %s1413_s7 }
 0x709   :  { %p1159_p3 = pnand %p1157_p2, %p1154_p1 }
 0x70b   :  { %1162 = shalt.err (!%p1159_p3)
}
 0x70c   :  { %835 = dma.vmem_to_hbm [thread:$0]  %s830_s24, 256, %s1413_s7, [#allocation5], %s1173_s1, %s1173_s1, %s1174_s25  }
 0x70d   :  { %1167 = dma.done.wait [#allocation5], 256  }
 0x70e   :  { %1168 = vsyncadd [#allocation5], 4294967040 }
 0x70f   :  { %839 = vsyncpa [#allocation4], 1 }
 0x710   :  { %840 = vsyncpa [#allocation7], 1 }
 0x711   :  { %841 = vsyncpa [#allocation5], 1 }

</bundles_post_ra>
